<compile_context>
chip_gen: v7x
topology: tpu7x:2x2x1
jax: 0.10.0
libtpu: 0.0.40
codegen_flags: <defaults>
</compile_context>

<pallas_src>
import numpy as np
import jax
import jax.numpy as jnp
from jax.experimental import pallas as pl
from jax.experimental.pallas import tpu as pltpu

LANE = 128
SUBLANE = 8


def _cb_loss_kernel(x_ref, t_ref, w_ref, out_ref):
    # x/t arrive in their storage dtype (f32 or bf16); compute in f32.
    x = x_ref[...].astype(jnp.float32)          # (tile_rows, 128)
    t = t_ref[...].astype(jnp.float32)          # (tile_rows, 128)
    w = w_ref[...]                              # f32, mean divisor already folded in

    # Numerically stable BCE-with-logits (matches PyTorch's formulation).
    bce = jnp.maximum(x, 0.0) - x * t + jnp.log1p(jnp.exp(-jnp.abs(x)))
    loss = bce * w                              # padded elems have w == 0

    # Per-tile partial sums, reduced only down to an (8, 128) slab so the
    # output store stays lane-dense and (8,128)-aligned.  The reshape splits
    # the sublane axis in groups of 8 (no lane crossing -> layout-friendly).
    tr = loss.shape[0]
    out_ref[...] = jnp.sum(loss.reshape(tr // SUBLANE, SUBLANE, LANE), axis=0)


def make_class_balanced_weights(samples_per_cls, beta=0.9999):
    samples_per_cls = np.asarray(samples_per_cls, dtype=np.float64)
    effective_num = 1.0 - np.power(beta, samples_per_cls)
    weights = (1.0 - beta) / effective_num
    weights = weights / np.sum(weights) * len(samples_per_cls)
    return jnp.asarray(weights, dtype=jnp.float32)


def class_balanced_loss(logits, targets, weights, reduction="mean", tile_rows=1024):
    """Pallas TPU implementation of ClassBalancedLoss.forward ('mean'/'sum')."""
    assert logits.shape == targets.shape and logits.ndim == 2
    B, C = logits.shape
    assert weights.shape == (C,)
    if reduction not in ("mean", "sum"):
        # TODO(synk): reduction='none' (elementwise output) not wired through the kernel.
        raise NotImplementedError("only reduction='mean'/'sum' implemented in the kernel")

    n = B * C
    divisor = float(n) if reduction == "mean" else 1.0

    # Per-element weight slab: class weight with the mean divisor folded in (f32).
    w_elem = jnp.tile(weights.astype(jnp.float32), B) * jnp.float32(1.0 / divisor)

    # Lane-dense layout: flatten to (total_rows, 128) rows of full lanes.
    rows_needed = pl.cdiv(n, LANE)
    rows_8 = ((rows_needed + SUBLANE - 1) // SUBLANE) * SUBLANE
    tr = max(SUBLANE, min(int(tile_rows), rows_8))
    tr = ((tr + SUBLANE - 1) // SUBLANE) * SUBLANE
    num_tiles = pl.cdiv(rows_8, tr)
    total_rows = num_tiles * tr
    pad = total_rows * LANE - n

    def to_slab(a):
        a = a.reshape(n)
        if pad:
            a = jnp.pad(a, (0, pad))
        return a.reshape(total_rows, LANE)

    x2 = to_slab(logits)      # original dtype: bf16 ships as bf16 (half the HBM bytes)
    t2 = to_slab(targets)
    w2 = to_slab(w_elem)      # zero-padded -> padded elements contribute exactly 0

    buf = pl.Buffered(3) if num_tiles >= 3 else None

    def in_spec():
        return pl.BlockSpec((tr, LANE), lambda i: (i, 0), pipeline_mode=buf)

    partial = pl.pallas_call(
        _cb_loss_kernel,
        out_shape=jax.ShapeDtypeStruct((num_tiles * SUBLANE, LANE), jnp.float32),
        grid_spec=pltpu.PrefetchScalarGridSpec(
            num_scalar_prefetch=0,
            grid=(num_tiles,),
            in_specs=[in_spec(), in_spec(), in_spec()],
            out_specs=pl.BlockSpec((SUBLANE, LANE), lambda i: (i, 0)),
        ),
        compiler_params=pltpu.CompilerParams(
            dimension_semantics=("parallel",),
            vmem_limit_bytes=32 * 1024 * 1024,
        ),
    )(x2, t2, w2)

    # Tiny final reduction of the per-tile partial sums.
    return jnp.sum(partial)


def _reference(logits, targets, weights, reduction="mean"):
    x = logits.astype(jnp.float32)
    t = targets.astype(jnp.float32)
    bce = jnp.maximum(x, 0.0) - x * t + jnp.log1p(jnp.exp(-jnp.abs(x)))
    loss = bce * weights[None, :].astype(jnp.float32)
    return jnp.mean(loss) if reduction == "mean" else jnp.sum(loss)


if __name__ == "__main__":
    key = jax.random.PRNGKey(0)
    k1, k2, k3, k4 = jax.random.split(key, 4)

    # Small multi-label problem matching the PyTorch module: batch=8, 4 classes.
    B, C = 8, 4
    samples_per_cls = [100, 50, 25, 10]
    weights = make_class_balanced_weights(samples_per_cls, beta=0.9999)

    logits = jax.random.normal(k1, (B, C), dtype=jnp.float32)
    targets = (jax.random.uniform(k2, (B, C)) > 0.5).astype(jnp.float32)

    # reduction='mean' (default)
    out = jax.block_until_ready(class_balanced_loss(logits, targets, weights))
    ref = jax.block_until_ready(_reference(logits, targets, weights))
    assert np.allclose(np.asarray(out), np.asarray(ref), rtol=1e-5, atol=1e-5), (out, ref)

    # reduction='sum'
    out_s = jax.block_until_ready(class_balanced_loss(logits, targets, weights, reduction="sum"))
    ref_s = jax.block_until_ready(_reference(logits, targets, weights, reduction="sum"))
    assert np.allclose(np.asarray(out_s), np.asarray(ref_s), rtol=1e-5, atol=1e-5), (out_s, ref_s)

    # bf16 inputs go over the DMA as bf16 (no wrapper upcast); compute stays f32.
    lo_bf = logits.astype(jnp.bfloat16)
    tg_bf = targets.astype(jnp.bfloat16)
    out_b = jax.block_until_ready(class_balanced_loss(lo_bf, tg_bf, weights))
    ref_b = jax.block_until_ready(_reference(lo_bf, tg_bf, weights))
    assert np.allclose(np.asarray(out_b), np.asarray(ref_b), rtol=1e-3, atol=1e-3), (out_b, ref_b)

    # Multi-tile + padding path: odd shapes, tiny tile_rows forces a 3-step grid.
    B2, C2 = 64, 33
    spc2 = (np.arange(C2, dtype=np.float64) + 1.0) * 10.0
    weights2 = make_class_balanced_weights(spc2, beta=0.999)
    lo2 = jax.random.normal(k3, (B2, C2), dtype=jnp.float32)
    tg2 = (jax.random.uniform(k4, (B2, C2)) > 0.5).astype(jnp.float32)
    out2 = jax.block_until_ready(class_balanced_loss(lo2, tg2, weights2, tile_rows=8))
    ref2 = jax.block_until_ready(_reference(lo2, tg2, weights2))
    assert np.allclose(np.asarray(out2), np.asarray(ref2), rtol=1e-5, atol=1e-5), (out2, ref2)

    print("KERNEL_OK")
</pallas_src>

<mosaic_0001>
module attributes {stable_mosaic.version = 11 : i64} {
  func.func @_cb_loss_kernel(%arg0: i32, %arg1: memref<8x128xf32, #tpu.memory_space<vmem>>, %arg2: memref<8x128xf32, #tpu.memory_space<vmem>>, %arg3: memref<8x128xf32, #tpu.memory_space<vmem>>, %arg4: memref<8x128xf32, #tpu.memory_space<vmem>>) attributes {dimension_semantics = [#tpu.dimension_semantics<parallel>], iteration_bounds = array<i64: 1>, scalar_prefetch = 0 : i64, scratch_operands = 0 : i64, tpu.core_type = #tpu.core_type<tc>, window_params = [{transform_indices = @transform_0, window_bounds = array<i64: 8, 128>}, {transform_indices = @transform_1, window_bounds = array<i64: 8, 128>}, {transform_indices = @transform_2, window_bounds = array<i64: 8, 128>}, {transform_indices = @transform_3, window_bounds = array<i64: 8, 128>}]} {
    %c0 = arith.constant 0 : index
    %c0_0 = arith.constant 0 : index
    %0 = vector.load %arg1[%c0, %c0_0] : memref<8x128xf32, #tpu.memory_space<vmem>>, vector<8x128xf32>
    %c0_1 = arith.constant 0 : index
    %c0_2 = arith.constant 0 : index
    %1 = vector.load %arg2[%c0_1, %c0_2] : memref<8x128xf32, #tpu.memory_space<vmem>>, vector<8x128xf32>
    %c0_3 = arith.constant 0 : index
    %c0_4 = arith.constant 0 : index
    %2 = vector.load %arg3[%c0_3, %c0_4] : memref<8x128xf32, #tpu.memory_space<vmem>>, vector<8x128xf32>
    %cst = arith.constant 0.000000e+00 : f32
    %3 = vector.broadcast %cst : f32 to vector<8x128xf32>
    %4 = arith.maximumf %0, %3 : vector<8x128xf32>
    %5 = arith.mulf %0, %1 : vector<8x128xf32>
    %6 = arith.subf %4, %5 : vector<8x128xf32>
    %7 = math.absf %0 : vector<8x128xf32>
    %cst_5 = arith.constant 0.000000e+00 : f32
    %8 = vector.broadcast %cst_5 : f32 to vector<8x128xf32>
    %9 = arith.subf %8, %7 : vector<8x128xf32>
    %10 = math.exp %9 : vector<8x128xf32>
    %11 = math.log1p %10 : vector<8x128xf32>
    %12 = arith.addf %6, %11 : vector<8x128xf32>
    %13 = arith.mulf %12, %2 : vector<8x128xf32>
    %14 = vector.shape_cast %13 : vector<8x128xf32> to vector<1x8x128xf32>
    %cst_6 = arith.constant dense<0.000000e+00> : vector<8x128xf32>
    %15 = vector.multi_reduction <add>, %14, %cst_6 [0] : vector<1x8x128xf32> to vector<8x128xf32>
    %c0_7 = arith.constant 0 : index
    %c0_8 = arith.constant 0 : index
    %16 = vector.load %arg4[%c0_7, %c0_8] : memref<8x128xf32, #tpu.memory_space<vmem>>, vector<8x128xf32>
    tpu.vector_store %arg4[%c0_7, %c0_8], %15 {strides = array<i32>} : memref<8x128xf32, #tpu.memory_space<vmem>>, vector<8x128xf32>,
    return
  }
  func.func @transform_0(%arg0: i32) -> (i32, i32) {
    %c0_i32 = arith.constant 0 : i32
    %c0_i32_0 = arith.constant 0 : i32
    return %arg0, %c0_i32 : i32, i32
  }
  func.func @transform_1(%arg0: i32) -> (i32, i32) {
    %c0_i32 = arith.constant 0 : i32
    %c0_i32_0 = arith.constant 0 : i32
    return %arg0, %c0_i32 : i32, i32
  }
  func.func @transform_2(%arg0: i32) -> (i32, i32) {
    %c0_i32 = arith.constant 0 : i32
    %c0_i32_0 = arith.constant 0 : i32
    return %arg0, %c0_i32 : i32, i32
  }
  func.func @transform_3(%arg0: i32) -> (i32, i32) {
    %c0_i32 = arith.constant 0 : i32
    %c0_i32_0 = arith.constant 0 : i32
    return %arg0, %c0_i32 : i32, i32
  }
}

</mosaic_0001>

<bundles_post_ra>
// kernel: tpu_custom_call.1
= control target key start
LH: loop header
LB: loop body
LE: loop exit
PB: predicated region body
PF: predicated region fallthrough
CT: control target
= control target key end

     0   :  { %8 = vsyncpa [#allocation3], 0  ;;  %s263_s0 = inlined_call_operand.hbm [shape: f32[8,128], index: 0, kind: input, shape index: {}]   ;;  %s264_s1 = inlined_call_operand.hbm [shape: f32[8,128], index: 1, kind: input, shape index: {}]   ;;  %s265_s2 = inlined_call_operand.hbm [shape: f32[8,128], index: 2, kind: input, shape index: {}]   ;;  %s266_s3 = inlined_call_operand.hbm [shape: f32[8,128], index: 3, kind: output, shape index: {}]  }
   0x1   :  { %9 = vsyncpa [#allocation6], 0 }
   0x2   :  { %10 = vsyncpa [#allocation4], 0  ;;  %s191_s12 = smov [#allocation5]   ;;  %s192_s14 = smov [#allocation2]  }
   0x3   :  { %s27_s13 = sshll.u32 %s191_s12, 4  ;;  %s17_s15 = sshll.u32 %s192_s14, 4  ;;  %s28_s13 = int_to_ptr.vmem [resolvable:$true] %s27_s13  ;;  %s18_s15 = int_to_ptr.vmem [resolvable:$true] %s17_s15 }
   0x4   :  { %s97_s18 = scalar_lea.hbm %s264_s1, 128 }
   0x5   :  { %p98_p0 = scmp.ne.s32.totalorder %s264_s1, %s97_s18  ;;  %p101_p1 = scmp.lt.u32.totalorder %s97_s18, %s264_s1 }
   0x7   :  { %p103_p2 = pnand %p101_p1, %p98_p0 }
   0x9   :  { %106 = shalt.err (!%p103_p2)
}
   0xa   :  { %s107_s23 = scalar_lea.vmem %s28_s13, 128  ;;  %p112_p4 = scmp.lt.s32.totalorder %s28_s13, %s28_s13 }
   0xb   :  { %p108_p3 = scmp.ne.s32.totalorder %s28_s13, %s107_s23  ;;  %p113_p5 = scmp.lt.s32.totalorder %s107_s23, %s107_s23 }
   0xd   :  { %p114_p6 = por %p113_p5, %p112_p4 }
   0xf   :  { %p115_p7 = pnand %p114_p6, %p108_p3 }
  0x11   :  { %118 = shalt.err (!%p115_p7)
}
  0x12   :  { %30 = dma.hbm_to_vmem [thread:$0]  %s264_s1, 128, %s28_s13, [#allocation6]  }
  0x13   :  { %s119_s28 = scalar_lea.hbm %s263_s0, 128 }
  0x14   :  { %p120_p8 = scmp.ne.s32.totalorder %s263_s0, %s119_s28  ;;  %p123_p9 = scmp.lt.u32.totalorder %s119_s28, %s263_s0 }
  0x16   :  { %p125_p10 = pnand %p123_p9, %p120_p8 }
  0x18   :  { %128 = shalt.err (!%p125_p10)
}
  0x19   :  { %s129_s6 = scalar_lea.vmem %s18_s15, 128  ;;  %p134_p12 = scmp.lt.s32.totalorder %s18_s15, %s18_s15 }
  0x1a   :  { %p130_p11 = scmp.ne.s32.totalorder %s18_s15, %s129_s6  ;;  %p135_p13 = scmp.lt.s32.totalorder %s129_s6, %s129_s6 }
  0x1c   :  { %p136_p0 = por %p135_p13, %p134_p12 }
  0x1e   :  { %p137_p1 = pnand %p136_p0, %p130_p11 }
  0x20   :  { %140 = shalt.err (!%p137_p1)
}
  0x21   :  { %20 = dma.hbm_to_vmem [thread:$0]  %s263_s0, 128, %s18_s15, [#allocation3]  }
  0x22   :  { %s193_s8 = smov [#allocation7]   ;;  %s141_s12 = scalar_lea.hbm %s265_s2, 128 }
  0x23   :  { %s37_s9 = sshll.u32 %s193_s8, 4  ;;  %p142_p2 = scmp.ne.s32.totalorder %s265_s2, %s141_s12  ;;  %s38_s9 = int_to_ptr.vmem [resolvable:$true] %s37_s9 }
  0x24   :  { %p145_p3 = scmp.lt.u32.totalorder %s141_s12, %s265_s2 }
  0x26   :  { %p147_p4 = pnand %p145_p3, %p142_p2 }
  0x28   :  { %150 = shalt.err (!%p147_p4)
}
  0x29   :  { %s151_s18 = scalar_lea.vmem %s38_s9, 128  ;;  %p156_p6 = scmp.lt.s32.totalorder %s38_s9, %s38_s9 }
  0x2a   :  { %p152_p5 = scmp.ne.s32.totalorder %s38_s9, %s151_s18  ;;  %p157_p7 = scmp.lt.s32.totalorder %s151_s18, %s151_s18 }
  0x2c   :  { %p158_p8 = por %p157_p7, %p156_p6 }
  0x2e   :  { %p159_p9 = pnand %p158_p8, %p152_p5 }
  0x30   :  { %162 = shalt.err (!%p159_p9)
}
  0x31   :  { %40 = dma.hbm_to_vmem [thread:$0]  %s265_s2, 128, %s38_s9, [#allocation6]  }
  0x32   :  { %185 = dma.done.wait [#allocation3], 128  }
  0x33   :  { %186 = vsyncadd [#allocation3], 4294967168 }
  0x34   :  { %187 = dma.done.wait [#allocation6], 256  }
  0x35   :  { %188 = vsyncadd [#allocation6], 4294967040  ;;  %v50_v0 = vld [vmem:[#allocation2] sm:$0xff]  ;;  %v51_v7 = vld [vmem:[#allocation5] sm:$0xff]  ;;  %s194_s2 = smov [#allocation8]  }
  0x36   :  { %v56_v1 = vand.u32 2147483647, %v50_v0  ;;  %v53_v9 = vmax.f32 %v50_v0, 0.0  ;;  %v54_v10 = vmul.f32 %v51_v7, %v50_v0  ;;  %v52_v16 = vld [vmem:[#allocation7] sm:$0xff]  ;;  %s79_s19 = sshll.u32 %s194_s2, 4  ;;  %s80_s19 = int_to_ptr.vmem [resolvable:$true] %s79_s19 }
  0x37   :  { %s163_s20 = scalar_lea.vmem %s80_s19, 128  ;;  %p168_p11 = scmp.lt.s32.totalorder %s80_s19, %s80_s19 }
  0x38   :  { %v57_v2 = vsub.f32 0.0, %v56_v1  ;;  %v55_v14 = vsub.f32 %v53_v9, %v54_v10  ;;  %p164_p10 = scmp.ne.s32.totalorder %s80_s19, %s163_s20  ;;  %p169_p12 = scmp.lt.s32.totalorder %s163_s20, %s163_s20 }
  0x3a   :  { %v58_v3 = vmul.f32 1.442695, %v57_v2  ;;  %p170_p13 = por %p169_p12, %p168_p11 }
  0x3c   :  { %93 = vpow2.f32 %v58_v3  ;;  %p171_p0 = pnand %p170_p13, %p164_p10 }
  0x46   :  { %v94_v4 = vpop.eup %93 }
  0x47   :  { %v60_v5 = vadd.f32 1.0, %v94_v4  ;;  %v63_v6 = vmul.f32 -0.5, %v94_v4  ;;  %v66_v11 = vand.u32 2147483647, %v94_v4 }
  0x49   :  { %95 = vlog2.f32 %v60_v5  ;;  %v64_v8 = vadd.f32 1.0, %v63_v6  ;;  %vm67_vm0 = vcmp.lt.f32.partialorder %v66_v11, 0.0004427343 }
  0x4b   :  { %v65_v12 = vmul.f32 %v94_v4, %v64_v8 }
  0x53   :  { %v96_v13 = vpop.eup %95 }
  0x54   :  { %v62_v15 = vmul.f32 0.6931472, %v96_v13 }
  0x56   :  { %v68_v17 = vsel %vm67_vm0, %v65_v12, %v62_v15 }
  0x57   :  { %v69_v18 = vadd.f32 %v68_v17, %v55_v14 }
  0x59   :  { %v70_v19 = vmul.f32 %v69_v18, %v52_v16 }
  0x5b   :  { %72 = vst [vmem:[#allocation8] sm:$0xff] %v70_v19 }
  0x5c   :  { %174 = shalt.err (!%p171_p0)
}
  0x5d   :  { %s175_s23 = scalar_lea.hbm %s266_s3, 128 }
  0x5e   :  { %p176_p1 = scmp.ne.s32.totalorder %s266_s3, %s175_s23  ;;  %p179_p2 = scmp.lt.u32.totalorder %s175_s23, %s266_s3 }
  0x60   :  { %p181_p3 = pnand %p179_p2, %p176_p1 }
  0x62   :  { %184 = shalt.err (!%p181_p3)
}
  0x63   :  { %82 = dma.vmem_to_hbm [thread:$0]  %s80_s19, 128, %s266_s3, [#allocation4]  }
  0x64   :  { %189 = dma.done.wait [#allocation4], 128  }
  0x65   :  { %190 = vsyncadd [#allocation4], 4294967168 }
  0x66   :  { %86 = vsyncpa [#allocation3], 1 }
  0x67   :  { %87 = vsyncpa [#allocation6], 1 }
  0x68   :  { %88 = vsyncpa [#allocation4], 1 }

</bundles_post_ra>
